<compile_context>
chip_gen: v5e
topology: v5e:2x2
jax: 0.10.0
libtpu: 0.0.40
codegen_flags: <defaults>
</compile_context>

<pallas_src>
import jax
import jax.numpy as jnp
from jax import lax
from jax.experimental import pallas as pl
from jax.experimental.pallas import tpu as pltpu

LANES = 128
SUBLANES = 8
# Rows consumed per inner-loop iteration.  A multiple of 32 so it
#  (a) divides every tile size we pick, and
#  (b) satisfies the packed sublane tiling of any input dtype
#      (8 rows for f32, 16 for bf16, 32 for int8/fp8).
CHUNK_ROWS = 32
N_ACC = CHUNK_ROWS // SUBLANES          # 4 parallel (8,128) accumulators


def _tpu_kind():
    try:
        return jax.devices()[0].device_kind.lower()
    except Exception:
        return ""


def _num_tensorcores(kind):
    # v7x has 2 TensorCores per chip; v5e / v6e have 1.
    return 2 if "v7" in kind else 1


def _default_tile_rows(kind):
    # 4 MiB f32 blocks on v6e/v7x, 2 MiB on v5e (its default scoped VMEM is
    # smaller and its HBM BW lower, so 2 MiB already amortizes step overhead).
    if "v6" in kind or "v7" in kind:
        return 8192
    return 4096


def _partial_sums(x2d, y2d, rows, tr, num_partials, n_elems, itemsize):
    """Returns a (num_partials*8, 128) f32 slab of per-lane partial sums."""
    total_steps = -(-rows // tr)                   # blocks along rows
    spp = -(-total_steps // num_partials)          # steps per partial / core
    last_block = total_steps - 1
    # Mask is required only when the final block overruns `rows`, or when a
    # partial gets a redundant (clamped) block.
    needs_mask = (rows % tr != 0) or (spp * num_partials != total_steps)
    chunks = tr // CHUNK_ROWS
    two = num_partials > 1

    def kernel(x_ref, y_ref, o_ref):
        if two:
            c = pl.program_id(0)                   # TensorCore / partial index
            i = pl.program_id(1)                   # reduction step
        else:
            c = 0
            i = pl.program_id(0)

        @pl.when(i == 0)
        def _():
            o_ref[...] = jnp.zeros_like(o_ref)

        start_row = (c * spp + i) * tr
        remaining = rows - start_row               # <= 0 on redundant steps

        def tile_sum(masked):
            # Stream the (tr,128) VMEM block in (32,128) chunks; never
            # materialize the full diff tile (no vreg spills), and fold into
            # 4 independent accumulators to break the add dependency chain.
            def body(j, accs):
                off = pl.multiple_of(j * CHUNK_ROWS, CHUNK_ROWS)
                xb = x_ref[pl.ds(off, CHUNK_ROWS), :].astype(jnp.float32)
                yb = y_ref[pl.ds(off, CHUNK_ROWS), :].astype(jnp.float32)
                d = jnp.abs(xb - yb)
                if masked:
                    row_ids = lax.broadcasted_iota(
                        jnp.int32, (CHUNK_ROWS, LANES), 0)
                    d = jnp.where(row_ids < (remaining - off), d, 0.0)
                return tuple(
                    accs[k] + d[k * SUBLANES:(k + 1) * SUBLANES, :]
                    for k in range(N_ACC))

            init = tuple(jnp.zeros((SUBLANES, LANES), jnp.float32)
                         for _ in range(N_ACC))
            accs = lax.fori_loop(0, chunks, body, init,
                                 unroll=min(8, chunks))
            total = accs[0]
            for k in range(1, N_ACC):
                total = total + accs[k]
            return total

        if needs_mask:
            # Interior steps stay mask-free; only the boundary / redundant
            # steps pay for the iota + compare + select.
            @pl.when(remaining >= tr)
            def _():
                o_ref[...] += tile_sum(False)

            @pl.when(remaining < tr)
            def _():
                o_ref[...] += tile_sum(True)
        else:
            o_ref[...] += tile_sum(False)

    if two:
        grid = (num_partials, spp)

        def in_map(c, i):
            # Clamp so no block is fully out of bounds; clamped redundant
            # steps are zeroed by the row mask above.
            return (jnp.minimum(c * spp + i, last_block), 0)

        out_map = lambda c, i: (c, 0)
        # CORE_PARALLEL shards the leading axis across the two v7x
        # TensorCores; fall back to "parallel" on older jax.
        sems = (getattr(pltpu, "CORE_PARALLEL", "parallel"), "arbitrary")
    else:
        grid = (spp,)

        def in_map(i):
            return (i, 0)

        out_map = lambda i: (0, 0)
        sems = ("arbitrary",)

    return pl.pallas_call(
        kernel,
        out_shape=jax.ShapeDtypeStruct((num_partials * SUBLANES, LANES),
                                       jnp.float32),
        grid_spec=pltpu.PrefetchScalarGridSpec(
            num_scalar_prefetch=0,
            grid=grid,
            in_specs=[
                pl.BlockSpec((tr, LANES), in_map),
                pl.BlockSpec((tr, LANES), in_map),
            ],
            out_specs=pl.BlockSpec((SUBLANES, LANES), out_map),
        ),
        compiler_params=pltpu.CompilerParams(
            dimension_semantics=sems,
            # >= default scoped VMEM on every chip, <= physical on every chip;
            # comfortably holds the double-buffered 2/4 MiB input blocks.
            vmem_limit_bytes=32 * 1024 * 1024,
        ),
        cost_estimate=pl.CostEstimate(
            flops=3 * n_elems,
            transcendentals=0,
            bytes_accessed=2 * n_elems * itemsize
            + num_partials * SUBLANES * LANES * 4,
        ),
    )(x2d, y2d)


def normal_loss(pred, label):
    """Mean L1 loss between `pred` and `label` (any matching shapes)."""
    assert pred.shape == label.shape, "pred/label must have the same shape"
    n_elems = pred.size
    itemsize = jnp.dtype(pred.dtype).itemsize

    kind = _tpu_kind()
    num_partials = _num_tensorcores(kind)
    tile_rows = _default_tile_rows(kind)

    flat_p = pred.reshape(-1)   # contiguous reshape: free, no copy
    flat_l = label.reshape(-1)

    # Pad only if the flat length is not lane-aligned, or smaller than one
    # (CHUNK_ROWS, 128) chunk.  The common aligned case is copy-free; the
    # zero padding contributes |0-0| = 0 to the sum.
    padded_len = max(-(-n_elems // LANES) * LANES, CHUNK_ROWS * LANES)
    pad = padded_len - n_elems
    if pad:
        flat_p = jnp.pad(flat_p, (0, pad))
        flat_l = jnp.pad(flat_l, (0, pad))

    rows = padded_len // LANES                       # always >= CHUNK_ROWS
    x2d = flat_p.reshape(rows, LANES)
    y2d = flat_l.reshape(rows, LANES)

    # Tile rows: a multiple of CHUNK_ROWS (hence of every dtype's packed
    # sublane tile), never larger than `rows`; the ragged last block is
    # masked in-kernel on boundary steps only.
    tr = min(tile_rows, (rows // CHUNK_ROWS) * CHUNK_ROWS)

    partials = _partial_sums(x2d, y2d, rows, tr, num_partials,
                             n_elems, itemsize)

    # Single tiny cross-lane reduce (<= 2*8*128 floats) + mean over TRUE count.
    return (jnp.sum(partials) / jnp.float32(n_elems)).astype(jnp.float32)


if __name__ == "__main__":
    key = jax.random.PRNGKey(0)
    k1, k2 = jax.random.split(key)

    # NCHW, small shapes: batch=2, channels=4, spatial=16x16
    pred = jax.random.normal(k1, (2, 4, 16, 16), dtype=jnp.float32)
    label = jax.random.normal(k2, (2, 4, 16, 16), dtype=jnp.float32)

    loss = jax.block_until_ready(normal_loss(pred, label))
    ref = jnp.mean(jnp.abs(pred - label))
    assert jnp.allclose(loss, ref, rtol=1e-5, atol=1e-6), (loss, ref)

    # Lane-unaligned shape (exercises pad path, no in-kernel mask needed).
    k3, k4 = jax.random.split(k2)
    p2 = jax.random.normal(k3, (2, 3, 17, 19), dtype=jnp.float32)
    l2 = jax.random.normal(k4, (2, 3, 17, 19), dtype=jnp.float32)
    loss2 = jax.block_until_ready(normal_loss(p2, l2))
    ref2 = jnp.mean(jnp.abs(p2 - l2))
    assert jnp.allclose(loss2, ref2, rtol=1e-5, atol=1e-6), (loss2, ref2)

    # Ragged row count (exercises the boundary-only masked chunk path).
    p3 = jax.random.normal(k1, (3, 5, 37, 29), dtype=jnp.float32)
    l3 = jax.random.normal(k2, (3, 5, 37, 29), dtype=jnp.float32)
    loss3 = jax.block_until_ready(normal_loss(p3, l3))
    ref3 = jnp.mean(jnp.abs(p3 - l3))
    assert jnp.allclose(loss3, ref3, rtol=1e-5, atol=1e-6), (loss3, ref3)

    print("KERNEL_OK")
</pallas_src>

<mosaic_0001>
module attributes {stable_mosaic.version = 11 : i64} {
  func.func @kernel(%arg0: i32, %arg1: memref<32x128xf32, #tpu.memory_space<vmem>>, %arg2: memref<32x128xf32, #tpu.memory_space<vmem>>, %arg3: memref<8x128xf32, #tpu.memory_space<vmem>>) attributes {dimension_semantics = [#tpu.dimension_semantics<arbitrary>], iteration_bounds = array<i64: 1>, scalar_prefetch = 0 : i64, scratch_operands = 0 : i64, tpu.core_type = #tpu.core_type<tc>, window_params = [{transform_indices = @transform_0, window_bounds = array<i64: 32, 128>}, {transform_indices = @transform_1, window_bounds = array<i64: 32, 128>}, {pipeline_mode = #tpu.pipeline_mode<synchronous>, transform_indices = @transform_2, window_bounds = array<i64: 8, 128>}]} {
    %c0_i32 = arith.constant 0 : i32
    %0 = arith.cmpi eq, %arg0, %c0_i32 : i32
    %1 = arith.extui %0 : i1 to i32
    %c0_i32_0 = arith.constant 0 : i32
    %2 = arith.cmpi ne, %1, %c0_i32_0 : i32
    scf.if %2 {
      %cst_10 = arith.constant 0.000000e+00 : f32
      %29 = vector.broadcast %cst_10 : f32 to vector<8x128xf32>
      %c0_11 = arith.constant 0 : index
      %c0_12 = arith.constant 0 : index
      %30 = vector.load %arg3[%c0_11, %c0_12] : memref<8x128xf32, #tpu.memory_space<vmem>>, vector<8x128xf32>
      tpu.vector_store %arg3[%c0_11, %c0_12], %29 {strides = array<i32>} : memref<8x128xf32, #tpu.memory_space<vmem>>, vector<8x128xf32>,
    } else {
    }
    %c0 = arith.constant 0 : index
    %c0_1 = arith.constant 0 : index
    %3 = vector.load %arg3[%c0, %c0_1] : memref<8x128xf32, #tpu.memory_space<vmem>>, vector<8x128xf32>
    %cst = arith.constant 0.000000e+00 : f32
    %4 = vector.broadcast %cst : f32 to vector<8x128xf32>
    %cst_2 = arith.constant 0.000000e+00 : f32
    %5 = vector.broadcast %cst_2 : f32 to vector<8x128xf32>
    %cst_3 = arith.constant 0.000000e+00 : f32
    %6 = vector.broadcast %cst_3 : f32 to vector<8x128xf32>
    %cst_4 = arith.constant 0.000000e+00 : f32
    %7 = vector.broadcast %cst_4 : f32 to vector<8x128xf32>
    %c0_i32_5 = arith.constant 0 : i32
    %c32_i32 = arith.constant 32 : i32
    %8 = arith.muli %c0_i32_5, %c32_i32 : i32
    %9 = tpu.assume_multiple %8, 32 : i32
    %10 = arith.index_cast %9 : i32 to index
    %c0_6 = arith.constant 0 : index
    %11 = vector.load %arg1[%10, %c0_6] : memref<32x128xf32, #tpu.memory_space<vmem>>, vector<32x128xf32>
    %12 = arith.index_cast %9 : i32 to index
    %c0_7 = arith.constant 0 : index
    %13 = vector.load %arg2[%12, %c0_7] : memref<32x128xf32, #tpu.memory_space<vmem>>, vector<32x128xf32>
    %14 = arith.subf %11, %13 : vector<32x128xf32>
    %15 = math.absf %14 : vector<32x128xf32>
    %16 = vector.extract_strided_slice %15 {offsets = [0, 0], sizes = [8, 128], strides = [1, 1]} : vector<32x128xf32> to vector<8x128xf32>
    %17 = arith.addf %4, %16 : vector<8x128xf32>
    %18 = vector.extract_strided_slice %15 {offsets = [8, 0], sizes = [8, 128], strides = [1, 1]} : vector<32x128xf32> to vector<8x128xf32>
    %19 = arith.addf %5, %18 : vector<8x128xf32>
    %20 = vector.extract_strided_slice %15 {offsets = [16, 0], sizes = [8, 128], strides = [1, 1]} : vector<32x128xf32> to vector<8x128xf32>
    %21 = arith.addf %6, %20 : vector<8x128xf32>
    %22 = vector.extract_strided_slice %15 {offsets = [24, 0], sizes = [8, 128], strides = [1, 1]} : vector<32x128xf32> to vector<8x128xf32>
    %23 = arith.addf %7, %22 : vector<8x128xf32>
    %c1_i32 = arith.constant 1 : i32
    %24 = arith.addf %17, %19 : vector<8x128xf32>
    %25 = arith.addf %24, %21 : vector<8x128xf32>
    %26 = arith.addf %25, %23 : vector<8x128xf32>
    %27 = arith.addf %3, %26 : vector<8x128xf32>
    %c0_8 = arith.constant 0 : index
    %c0_9 = arith.constant 0 : index
    %28 = vector.load %arg3[%c0_8, %c0_9] : memref<8x128xf32, #tpu.memory_space<vmem>>, vector<8x128xf32>
    tpu.vector_store %arg3[%c0_8, %c0_9], %27 {strides = array<i32>} : memref<8x128xf32, #tpu.memory_space<vmem>>, vector<8x128xf32>,
    return
  }
  func.func @transform_0(%arg0: i32) -> (i32, i32) {
    %c0_i32 = arith.constant 0 : i32
    %c0_i32_0 = arith.constant 0 : i32
    return %arg0, %c0_i32 : i32, i32
  }
  func.func @transform_1(%arg0: i32) -> (i32, i32) {
    %c0_i32 = arith.constant 0 : i32
    %c0_i32_0 = arith.constant 0 : i32
    return %arg0, %c0_i32 : i32, i32
  }
  func.func @transform_2(%arg0: i32) -> (i32, i32) {
    %c0_i32 = arith.constant 0 : i32
    %c0_i32_0 = arith.constant 0 : i32
    %c0_i32_1 = arith.constant 0 : i32
    return %c0_i32, %c0_i32_0 : i32, i32
  }
}

</mosaic_0001>

<bundles_post_ra>
// kernel: tpu_custom_call.1
= control target key start
LH: loop header
LB: loop body
LE: loop exit
PB: predicated region body
PF: predicated region fallthrough
CT: control target
= control target key end

     0   :  { %7 = vsyncpa [#allocation3], 0  ;;  %s206_s0 = inlined_call_operand.hbm [shape: f32[32,128], index: 0, kind: input, shape index: {}]   ;;  %s207_s1 = inlined_call_operand.hbm [shape: f32[32,128], index: 1, kind: input, shape index: {}]   ;;  %s208_s2 = inlined_call_operand.hbm [shape: f32[8,128], index: 2, kind: output, shape index: {}]  }
   0x1   :  { %8 = vsyncpa [#allocation6], 0 }
   0x2   :  { %9 = vsyncpa [#allocation4], 0  ;;  %s14_s11 = sshll.u32 %s206_s0, 4  ;;  %s177_s12 = smov [#allocation2]   ;;  %s15_s11 = int_to_ptr.hbm [resolvable:$true] %s14_s11 }
   0x3   :  { %s16_s13 = sshll.u32 %s177_s12, 4  ;;  %s27_s16 = sshll.u32 %s207_s1, 4  ;;  %s17_s13 = int_to_ptr.vmem [resolvable:$true] %s16_s13  ;;  %s28_s16 = int_to_ptr.hbm [resolvable:$true] %s27_s16 }
   0x4   :  { %s178_s17 = smov 128   ;;  %s179_s18 = smov 8  }
   0x5   :  { %22 = dma.hbm_to_vmem [thread:$0]  %s15_s11, 512, %s17_s13, [#allocation3], %s178_s17, %s178_s17, %s179_s18  }
   0x6   :  { %s180_s19 = smov [#allocation5]  }
   0x7   :  { %s29_s20 = sshll.u32 %s180_s19, 4  ;;  %s30_s20 = int_to_ptr.vmem [resolvable:$true] %s29_s20 }
   0x8   :  { %35 = dma.hbm_to_vmem [thread:$0]  %s28_s16, 512, %s30_s20, [#allocation6], %s178_s17, %s178_s17, %s179_s18  }
   0x9   :  { %171 = dma.done.wait [#allocation3], 512  }
   0xa   :  { %172 = vsyncadd [#allocation3], 4294966784 }
   0xb   :  { %173 = dma.done.wait [#allocation6], 512  }
   0xc   :  { %174 = vsyncadd [#allocation6], 4294966784  ;;  %v50_v0 = vld [vmem:[#allocation2] sm:$0xff]  ;;  %v51_v1 = vld [vmem:[#allocation2 + $0x8] sm:$0xff]  ;;  %s181_s0 = smov [#allocation7]   ;;  %s82_s23 = sshll.u32 %s208_s2, 4  ;;  %s83_s23 = int_to_ptr.hbm [resolvable:$true] %s82_s23 }
   0xd   :  { %v52_v2 = vld [vmem:[#allocation2 + $0x10] sm:$0xff]  ;;  %v53_v3 = vld [vmem:[#allocation2 + $0x18] sm:$0xff]  ;;  %v54_v4 = vld [vmem:[#allocation5] sm:$0xff]  ;;  %s80_s1 = sshll.u32 %s181_s0, 4  ;;  %s81_s1 = int_to_ptr.vmem [resolvable:$true] %s80_s1 }
   0xe   :  { %v55_v5 = vld [vmem:[#allocation5 + $0x8] sm:$0xff]  ;;  %v56_v6 = vld [vmem:[#allocation5 + $0x10] sm:$0xff]  ;;  %v57_v7 = vld [vmem:[#allocation5 + $0x18] sm:$0xff]  ;;  %v58_v8 = vsub.f32 %v50_v0, %v54_v4 }
   0xf   :  { %v59_v9 = vsub.f32 %v51_v1, %v55_v5  ;;  %v60_v10 = vsub.f32 %v52_v2, %v56_v6  ;;  %v61_v11 = vsub.f32 %v53_v3, %v57_v7 }
  0x10   :  { %v62_v12 = vand.u32 2147483647, %v58_v8 }
  0x11   :  { %v63_v13 = vand.u32 2147483647, %v59_v9  ;;  %v64_v14 = vand.u32 2147483647, %v60_v10  ;;  %v65_v15 = vand.u32 2147483647, %v61_v11 }
  0x13   :  { %v70_v16 = vadd.f32 %v63_v13, %v62_v12 }
  0x15   :  { %v71_v17 = vadd.f32 %v70_v16, %v64_v14 }
  0x17   :  { %v72_v18 = vadd.f32 %v71_v17, %v65_v15 }
  0x19   :  { %74 = vst [vmem:[#allocation7] sm:$0xff] %v72_v18 }
  0x1a   :  { %85 = dma.vmem_to_hbm [thread:$0]  %s81_s1, 128, %s83_s23, [#allocation4]  }
  0x1b   :  { %175 = dma.done.wait [#allocation4], 128  }
  0x1c   :  { %176 = vsyncadd [#allocation4], 4294967168 }
  0x1d   :  { %90 = vsyncpa [#allocation3], 1 }
  0x1e   :  { %91 = vsyncpa [#allocation6], 1 }
  0x1f   :  { %92 = vsyncpa [#allocation4], 1 }

</bundles_post_ra>
